<compile_context>
chip_gen: v7x
topology: tpu7x:2x2x1
jax: 0.10.0
libtpu: 0.0.40
codegen_flags: <defaults>
</compile_context>

<pallas_src>
import jax
import jax.numpy as jnp
from jax.experimental import pallas as pl
from jax.experimental.pallas import tpu as pltpu

_TARGET_INPUT_BYTES_PER_STEP = 4 * 1024 * 1024  # ~4 MiB/step -> ~85%+ of HBM roofline


def _copy_switch_kernel(s_ref, c_ref, wd_ref, we_ref, b_ref, o_ref):
    # s_ref : [Bt, dec_hidden]  (VMEM, f32 or bf16)
    # c_ref : [Bt, enc_hidden]  (VMEM, f32 or bf16)
    # wd_ref: [1, dec_hidden]   (VMEM, f32)  lane-dense weight row (decoder part)
    # we_ref: [1, enc_hidden]   (VMEM, f32)  lane-dense weight row (context part)
    # b_ref : [1, 1]            (SMEM, f32)  bias scalar
    # o_ref : [Bt, 1]           (VMEM, f32)
    #
    # VPU multiply + XLU lane reduction; stays off the MXU (an N=1 matmul would
    # use 1/128 of the MXU columns and pay fill/drain latency for ~no FLOPs).
    # Accumulation is in f32 even for bf16 activations.
    s = s_ref[...].astype(jnp.float32)
    c = c_ref[...].astype(jnp.float32)
    acc = jnp.sum(s * wd_ref[...], axis=-1, keepdims=True)
    acc = acc + jnp.sum(c * we_ref[...], axis=-1, keepdims=True)
    acc = acc + b_ref[0, 0]
    o_ref[...] = jax.nn.sigmoid(acc).astype(o_ref.dtype)


def _round_up(x, m):
    return ((x + m - 1) // m) * m


def _sublane_multiple(*dtypes):
    # f32 -> 8 rows, bf16 -> 16 rows, int8/fp8 -> 32 rows per native tile.
    itemsize = min(jnp.dtype(d).itemsize for d in dtypes)
    return max(8, 32 // max(itemsize, 1))


def copy_switch(decoder_state, context, weight, bias, *, b_tile=None):
    """Pallas implementation of CopySwitch.forward.

    Args:
      decoder_state: [B, dec_hidden] f32 or bf16
      context:       [B, enc_hidden] f32 or bf16
      weight:        [1, dec_hidden + enc_hidden]  (nn.Linear layout, columns
                     ordered to multiply concat([decoder_state, context]))
      bias:          [1]
      b_tile:        optional batch tile override (rows per grid step).
    Returns:
      p: [B, 1] float32
    """
    B, dec_h = decoder_state.shape
    Bc, enc_h = context.shape
    assert B == Bc, (decoder_state.shape, context.shape)
    hid = dec_h + enc_h
    assert weight.shape == (1, hid), weight.shape

    # Lane-dense weight rows: no transpose, no [K, 1] padding. Bias -> SMEM scalar.
    w_dec = weight[:, :dec_h].astype(jnp.float32)   # [1, dec_hidden]
    w_enc = weight[:, dec_h:].astype(jnp.float32)   # [1, enc_hidden]
    b = jnp.asarray(bias, jnp.float32).reshape(1, 1)

    in_itemsize = max(jnp.dtype(decoder_state.dtype).itemsize,
                      jnp.dtype(context.dtype).itemsize)
    sub = _sublane_multiple(decoder_state.dtype, context.dtype)

    if b_tile is None:
        # Adaptive tile: ~4 MiB of combined activation rows per grid step.
        bt = _TARGET_INPUT_BYTES_PER_STEP // max(1, hid * in_itemsize)
        bt = max(sub, (bt // sub) * sub)
        # v7x megacore: keep >= 2 grid points whenever the batch permits so the
        # "parallel" grid axis can be sharded across both TensorCores.
        bt = min(bt, _round_up(pl.cdiv(B, 2), sub))
        b_tile = bt
    else:
        b_tile = _round_up(max(int(b_tile), sub), sub)

    if b_tile >= B:
        b_tile = B                      # single full-extent block (always legal)
    num_tiles = pl.cdiv(B, b_tile)      # partial last tile is masked by Pallas

    # Explicit scoped-VMEM budget: 2 pipeline buffers per activation input,
    # an f32 product temporary upper bound, and the lane-padded output tile.
    in_bytes = b_tile * hid * in_itemsize
    f32_tmp = b_tile * hid * 4
    out_bytes = b_tile * 128 * 4
    vmem_est = 2 * in_bytes + 2 * out_bytes + f32_tmp + (hid + 1024) * 4
    vmem_limit = int(min(max(2 * vmem_est, 32 * 1024 * 1024), 48 * 1024 * 1024))

    cost = pl.CostEstimate(
        flops=2 * B * hid + 3 * B,
        transcendentals=B,
        bytes_accessed=in_itemsize * B * hid + 4 * (B + hid + 1),
    )

    return pl.pallas_call(
        _copy_switch_kernel,
        out_shape=jax.ShapeDtypeStruct((B, 1), jnp.float32),
        grid=(num_tiles,),
        in_specs=[
            pl.BlockSpec((b_tile, dec_h), lambda i: (i, 0)),   # decoder_state
            pl.BlockSpec((b_tile, enc_h), lambda i: (i, 0)),   # context
            pl.BlockSpec((1, dec_h), lambda i: (0, 0)),        # w_dec row
            pl.BlockSpec((1, enc_h), lambda i: (0, 0)),        # w_enc row
            pl.BlockSpec((1, 1), lambda i: (0, 0),
                         memory_space=pltpu.SMEM),             # bias scalar
        ],
        out_specs=pl.BlockSpec((b_tile, 1), lambda i: (i, 0)),
        compiler_params=pltpu.CompilerParams(
            dimension_semantics=("parallel",),
            vmem_limit_bytes=vmem_limit),
        cost_estimate=cost,
    )(decoder_state, context, w_dec, w_enc, b)


def copy_switch_ref(decoder_state, context, weight, bias):
    """Pure-JAX reference matching the PyTorch forward exactly (f32 math)."""
    x = jnp.concatenate([decoder_state.astype(jnp.float32),
                         context.astype(jnp.float32)], axis=1)
    p = x @ weight.astype(jnp.float32).T + bias.astype(jnp.float32)
    return jax.nn.sigmoid(p)


if __name__ == "__main__":
    # Small shapes consistent with the module (scaled-down hidden sizes).
    ENC_HIDDEN = 32
    DEC_HIDDEN = 16
    fan_in = ENC_HIDDEN + DEC_HIDDEN

    key = jax.random.PRNGKey(0)
    k_s, k_c, k_w, k_b = jax.random.split(key, 4)

    # Deterministic init (mimics nn.Linear's uniform(-1/sqrt(in), 1/sqrt(in))).
    bound = 1.0 / (fan_in ** 0.5)
    weight = jax.random.uniform(
        k_w, (1, fan_in), minval=-bound, maxval=bound, dtype=jnp.float32)
    bias = jax.random.uniform(
        k_b, (1,), minval=-bound, maxval=bound, dtype=jnp.float32)

    # --- 1) single-tile case (B fits in one full-extent block) ---
    B = 8
    ds = jax.random.normal(k_s, (B, DEC_HIDDEN), dtype=jnp.float32)
    ctx = jax.random.normal(k_c, (B, ENC_HIDDEN), dtype=jnp.float32)
    p = jax.block_until_ready(copy_switch(ds, ctx, weight, bias))
    p_ref = copy_switch_ref(ds, ctx, weight, bias)
    assert p.shape == (B, 1)
    assert jnp.allclose(p, p_ref, atol=1e-5, rtol=1e-5)

    # --- 2) explicit multi-tile case (exercises the batch grid) ---
    B2 = 32
    ds2 = jax.random.normal(k_s, (B2, DEC_HIDDEN), dtype=jnp.float32)
    ctx2 = jax.random.normal(k_c, (B2, ENC_HIDDEN), dtype=jnp.float32)
    p2 = jax.block_until_ready(copy_switch(ds2, ctx2, weight, bias, b_tile=8))
    assert p2.shape == (B2, 1)
    assert jnp.allclose(p2, copy_switch_ref(ds2, ctx2, weight, bias),
                        atol=1e-5, rtol=1e-5)

    # --- 3) adaptive tiling with a partial last tile (B % b_tile != 0) ---
    B3 = 40
    ds3 = jax.random.normal(k_s, (B3, DEC_HIDDEN), dtype=jnp.float32)
    ctx3 = jax.random.normal(k_c, (B3, ENC_HIDDEN), dtype=jnp.float32)
    p3 = jax.block_until_ready(copy_switch(ds3, ctx3, weight, bias))
    assert p3.shape == (B3, 1)
    assert jnp.allclose(p3, copy_switch_ref(ds3, ctx3, weight, bias),
                        atol=1e-5, rtol=1e-5)

    # --- 4) bf16 activations pass through (f32 accumulation in-kernel) ---
    B4 = 48
    ds4 = jax.random.normal(k_s, (B4, DEC_HIDDEN), dtype=jnp.float32).astype(jnp.bfloat16)
    ctx4 = jax.random.normal(k_c, (B4, ENC_HIDDEN), dtype=jnp.float32).astype(jnp.bfloat16)
    p4 = jax.block_until_ready(copy_switch(ds4, ctx4, weight, bias))
    assert p4.shape == (B4, 1)
    assert jnp.allclose(p4, copy_switch_ref(ds4, ctx4, weight, bias),
                        atol=1e-5, rtol=1e-5)

    print("KERNEL_OK")
</pallas_src>

<mosaic_0001>
module attributes {stable_mosaic.version = 11 : i64} {
  func.func @_copy_switch_kernel(%arg0: i32, %arg1: memref<8x16xf32, #tpu.memory_space<vmem>>, %arg2: memref<8x32xf32, #tpu.memory_space<vmem>>, %arg3: memref<1x16xf32, #tpu.memory_space<vmem>>, %arg4: memref<1x32xf32, #tpu.memory_space<vmem>>, %arg5: memref<1x1xf32, #tpu.memory_space<smem>>, %arg6: memref<8x1xf32, #tpu.memory_space<vmem>>) attributes {dimension_semantics = [#tpu.dimension_semantics<parallel>], iteration_bounds = array<i64: 1>, scalar_prefetch = 0 : i64, scratch_operands = 0 : i64, tpu.core_type = #tpu.core_type<tc>, window_params = [{transform_indices = @transform_0, window_bounds = array<i64: 8, 16>}, {transform_indices = @transform_1, window_bounds = array<i64: 8, 32>}, {pipeline_mode = #tpu.pipeline_mode<synchronous>, transform_indices = @transform_2, window_bounds = array<i64: 1, 16>}, {pipeline_mode = #tpu.pipeline_mode<synchronous>, transform_indices = @transform_3, window_bounds = array<i64: 1, 32>}, {transform_indices = @transform_4, window_bounds = array<i64: 1, 1>}, {transform_indices = @transform_5, window_bounds = array<i64: 8, 1>}]} {
    %c0 = arith.constant 0 : index
    %c0_0 = arith.constant 0 : index
    %0 = vector.load %arg1[%c0, %c0_0] : memref<8x16xf32, #tpu.memory_space<vmem>>, vector<8x16xf32>
    %c0_1 = arith.constant 0 : index
    %c0_2 = arith.constant 0 : index
    %1 = vector.load %arg2[%c0_1, %c0_2] : memref<8x32xf32, #tpu.memory_space<vmem>>, vector<8x32xf32>
    %c0_3 = arith.constant 0 : index
    %c0_4 = arith.constant 0 : index
    %2 = vector.load %arg3[%c0_3, %c0_4] : memref<1x16xf32, #tpu.memory_space<vmem>>, vector<1x16xf32>
    %3 = vector.broadcast %2 : vector<1x16xf32> to vector<8x16xf32>
    %4 = arith.mulf %0, %3 : vector<8x16xf32>
    %cst = arith.constant dense<0.000000e+00> : vector<8xf32>
    %5 = vector.multi_reduction <add>, %4, %cst [1] : vector<8x16xf32> to vector<8xf32>
    %6 = vector.shape_cast %5 : vector<8xf32> to vector<8x1xf32>
    %c0_5 = arith.constant 0 : index
    %c0_6 = arith.constant 0 : index
    %7 = vector.load %arg4[%c0_5, %c0_6] : memref<1x32xf32, #tpu.memory_space<vmem>>, vector<1x32xf32>
    %8 = vector.broadcast %7 : vector<1x32xf32> to vector<8x32xf32>
    %9 = arith.mulf %1, %8 : vector<8x32xf32>
    %cst_7 = arith.constant dense<0.000000e+00> : vector<8xf32>
    %10 = vector.multi_reduction <add>, %9, %cst_7 [1] : vector<8x32xf32> to vector<8xf32>
    %11 = vector.shape_cast %10 : vector<8xf32> to vector<8x1xf32>
    %12 = arith.addf %6, %11 : vector<8x1xf32>
    %c0_8 = arith.constant 0 : index
    %c0_9 = arith.constant 0 : index
    %13 = memref.load %arg5[%c0_8, %c0_9] : memref<1x1xf32, #tpu.memory_space<smem>>
    %14 = vector.broadcast %13 : f32 to vector<8x1xf32>
    %15 = arith.addf %12, %14 : vector<8x1xf32>
    %16 = arith.negf %15 : vector<8x1xf32>
    %17 = math.exp %16 : vector<8x1xf32>
    %cst_10 = arith.constant 1.000000e+00 : f32
    %18 = vector.broadcast %cst_10 : f32 to vector<8x1xf32>
    %19 = arith.addf %18, %17 : vector<8x1xf32>
    %20 = arith.divf %18, %19 : vector<8x1xf32>
    %c0_11 = arith.constant 0 : index
    %c0_12 = arith.constant 0 : index
    %21 = vector.load %arg6[%c0_11, %c0_12] : memref<8x1xf32, #tpu.memory_space<vmem>>, vector<8x1xf32>
    tpu.vector_store %arg6[%c0_11, %c0_12], %20 {strides = array<i32>} : memref<8x1xf32, #tpu.memory_space<vmem>>, vector<8x1xf32>,
    return
  }
  func.func @transform_0(%arg0: i32) -> (i32, i32) {
    %c0_i32 = arith.constant 0 : i32
    %c0_i32_0 = arith.constant 0 : i32
    return %arg0, %c0_i32 : i32, i32
  }
  func.func @transform_1(%arg0: i32) -> (i32, i32) {
    %c0_i32 = arith.constant 0 : i32
    %c0_i32_0 = arith.constant 0 : i32
    return %arg0, %c0_i32 : i32, i32
  }
  func.func @transform_2(%arg0: i32) -> (i32, i32) {
    %c0_i32 = arith.constant 0 : i32
    %c0_i32_0 = arith.constant 0 : i32
    %c0_i32_1 = arith.constant 0 : i32
    return %c0_i32, %c0_i32_0 : i32, i32
  }
  func.func @transform_3(%arg0: i32) -> (i32, i32) {
    %c0_i32 = arith.constant 0 : i32
    %c0_i32_0 = arith.constant 0 : i32
    %c0_i32_1 = arith.constant 0 : i32
    return %c0_i32, %c0_i32_0 : i32, i32
  }
  func.func @transform_4(%arg0: i32) -> (i32, i32) {
    %c0_i32 = arith.constant 0 : i32
    %c0_i32_0 = arith.constant 0 : i32
    %c0_i32_1 = arith.constant 0 : i32
    return %c0_i32, %c0_i32_0 : i32, i32
  }
  func.func @transform_5(%arg0: i32) -> (i32, i32) {
    %c0_i32 = arith.constant 0 : i32
    %c0_i32_0 = arith.constant 0 : i32
    return %arg0, %c0_i32 : i32, i32
  }
}

</mosaic_0001>

<bundles_post_ra>
// kernel: tpu_custom_call.1
= control target key start
LH: loop header
LB: loop body
LE: loop exit
PB: predicated region body
PF: predicated region fallthrough
CT: control target
= control target key end

     0   :  { %11 = vsyncpa [#allocation4], 0  ;;  %s214_s0 = inlined_call_operand.hbm [shape: f32[8,16], index: 0, kind: input, shape index: {}]   ;;  %s215_s1 = inlined_call_operand.hbm [shape: f32[8,32], index: 1, kind: input, shape index: {}]   ;;  %s216_s2 = inlined_call_operand.vmem [shape: f32[1,16], index: 2, kind: input, shape index: {}]   ;;  %s217_s3 = inlined_call_operand.vmem [shape: f32[1,32], index: 3, kind: input, shape index: {}]   ;;  %s218_s4 = inlined_call_operand.<no memory space> [shape: f32[1,1], index: 4, kind: input, shape index: {}]   ;;  %s219_s5 = inlined_call_operand.vmem [shape: f32[8,1], index: 5, kind: output, shape index: {}]  }
   0x1   :  { %12 = vsyncpa [#allocation6], 0  ;;  %s146_s18 = smov [#allocation3]   ;;  %s147_s20 = smov [#allocation5]  }
   0x2   :  { %s19_s19 = sshll.u32 %s146_s18, 4  ;;  %s29_s21 = sshll.u32 %s147_s20, 4  ;;  %s20_s19 = int_to_ptr.vmem [resolvable:$true] %s19_s19  ;;  %s30_s21 = int_to_ptr.vmem [resolvable:$true] %s29_s21 }
   0x3   :  { %s98_s24 = scalar_lea.hbm %s214_s0, 128 }
   0x4   :  { %p99_p0 = scmp.ne.s32.totalorder %s214_s0, %s98_s24  ;;  %p102_p1 = scmp.lt.u32.totalorder %s98_s24, %s214_s0 }
   0x6   :  { %p104_p2 = pnand %p102_p1, %p99_p0 }
   0x8   :  { %107 = shalt.err (!%p104_p2)
}
   0x9   :  { %s108_s29 = scalar_lea.vmem %s20_s19, 128  ;;  %p113_p4 = scmp.lt.s32.totalorder %s20_s19, %s20_s19 }
   0xa   :  { %p109_p3 = scmp.ne.s32.totalorder %s20_s19, %s108_s29  ;;  %p114_p5 = scmp.lt.s32.totalorder %s108_s29, %s108_s29 }
   0xc   :  { %p115_p6 = por %p114_p5, %p113_p4 }
   0xe   :  { %p116_p7 = pnand %p115_p6, %p109_p3 }
  0x10   :  { %119 = shalt.err (!%p116_p7)
}
  0x11   :  { %22 = dma.hbm_to_vmem [thread:$0]  %s214_s0, 128, %s20_s19, [#allocation4]  }
  0x12   :  { %s120_s9 = scalar_lea.hbm %s215_s1, 128 }
  0x13   :  { %p121_p8 = scmp.ne.s32.totalorder %s215_s1, %s120_s9  ;;  %p124_p9 = scmp.lt.u32.totalorder %s120_s9, %s215_s1 }
  0x15   :  { %p126_p10 = pnand %p124_p9, %p121_p8 }
  0x17   :  { %129 = shalt.err (!%p126_p10)
}
  0x18   :  { %s130_s14 = scalar_lea.vmem %s30_s21, 128  ;;  %p135_p12 = scmp.lt.s32.totalorder %s30_s21, %s30_s21 }
  0x19   :  { %p131_p11 = scmp.ne.s32.totalorder %s30_s21, %s130_s14  ;;  %p136_p13 = scmp.lt.s32.totalorder %s130_s14, %s130_s14 }
  0x1b   :  { %p137_p0 = por %p136_p13, %p135_p12 }
  0x1d   :  { %p138_p1 = pnand %p137_p0, %p131_p11 }
  0x1f   :  { %141 = shalt.err (!%p138_p1)
}
  0x20   :  { %32 = dma.hbm_to_vmem [thread:$0]  %s215_s1, 128, %s30_s21, [#allocation6]  }
  0x21   :  { %142 = dma.done.wait [#allocation4], 128  }
  0x22   :  { %143 = vsyncadd [#allocation4], 4294967168 }
  0x23   :  { %144 = dma.done.wait [#allocation6], 128  }
  0x24   :  { %145 = vsyncadd [#allocation6], 4294967168  ;;  %v45_v0 = vld [vmem:[#allocation3] sm:$0xff]  ;;  %vm55_vm0 = vcmask 130048   ;;  %v46_v2 = vld [vmem:[#allocation5] sm:$0xff]  ;;  %vm67_vm1 = vcmask 261120   ;;  %v73_v9 = vstv %s218_s4 }
  0x25   :  { %v89_v1 = vld [vmem:[%s216_s2] ss:$0 sm:$0xff]  ;;  %vm81_vm2 = vcmask 7168  }
  0x26   :  { %v54_v3 = vmul.f32 %v89_v1, %v45_v0  ;;  %v90_v4 = vld [vmem:[%s217_s3] ss:$0 sm:$0xff] }
  0x27   :  { %v66_v5 = vmul.f32 %v90_v4, %v46_v2 }
  0x28   :  { %v56_v6 = vsel %vm55_vm0, %v54_v3, 0.0 }
  0x29   :  { %57 = vadd.xlane.f32.xlu0 %v56_v6  ;;  %v68_v7 = vsel %vm67_vm1, %v66_v5, 0.0 }
  0x2d   :  { %69 = vadd.xlane.f32.xlu0 %v68_v7 }
  0xb6   :  { %v58_v8 = vpop.xlane.xlu0 %57 }
  0xba   :  { %v70_v10 = vpop.xlane.xlu0 %69 }
  0xbb   :  { %v71_v11 = vadd.f32 %v70_v10, %v58_v8 }
  0xbd   :  { %v74_v12 = vadd.f32 %v73_v9, %v71_v11 }
  0xbf   :  { %v91_v13 = vmul.f32 -1.442695, %v74_v12 }
  0xc1   :  { %94 = vpow2.f32 %v91_v13 }
  0xcb   :  { %v95_v14 = vpop.eup %94 }
  0xcc   :  { %v78_v15 = vadd.f32 1.0, %v95_v14 }
  0xce   :  { %96 = vrcp.f32 %v78_v15 }
  0xd8   :  { %v97_v16 = vpop.eup %96 }
  0xd9   :  { %82 = vst.msk [vmem:[%s219_s5] sm:$0xff] %vm81_vm2, %v97_v16 }
  0xda   :  { %87 = vsyncpa [#allocation4], 1 }
  0xdb   :  { %88 = vsyncpa [#allocation6], 1 }

</bundles_post_ra>
